<compile_context>
chip_gen: v6e
topology: v6e:2x2x1
jax: 0.10.0
libtpu: 0.0.40
codegen_flags: <defaults>
</compile_context>

<pallas_src>
import functools
import math

import jax
import jax.numpy as jnp
from jax.experimental import pallas as pl
from jax.experimental.pallas import tpu as pltpu

LOG_STD_MAX = 2.0
LOG_STD_MIN = -20.0
HEAD_PAD = 128                      # lane-padded width of each policy head

_LOG2 = math.log(2.0)
_HALF_LOG_2PI = 0.5 * math.log(2.0 * math.pi)


def _affine(x, wb_ref):
    """y = x @ W + b, with b packed as the last row of wb_ref ([in+1, out])."""
    n_in = wb_ref.shape[0] - 1                     # static
    return (jnp.dot(x, wb_ref[:n_in, :], preferred_element_type=jnp.float32)
            + wb_ref[n_in:, :])


def _actor_kernel(x_ref, eps_ref, wb0_ref, wb1_ref, wbh_ref, out_ref,
                  *, act_limit, act_dim):
    tile_b = out_ref.shape[0]

    # --- MLP trunk: two hidden layers, ReLU activation + ReLU output activation.
    h = jnp.maximum(_affine(x_ref[...], wb0_ref), 0.0)
    h = jnp.maximum(_affine(h, wb1_ref), 0.0)

    # --- Fused, lane-padded policy heads: [mean(128) | logstd(128)] in one matmul.
    heads = _affine(h, wbh_ref)                        # (tile_b, 2*HEAD_PAD)
    mean = heads[:, :HEAD_PAD]                         # valid in lanes [0, act_dim)
    logstd = jnp.clip(heads[:, HEAD_PAD:], LOG_STD_MIN, LOG_STD_MAX)
    std = jnp.exp(logstd)

    # --- rsample: pi = mean + std * eps  (eps streamed in, lane-padded).
    eps = eps_ref[...]                                 # (tile_b, HEAD_PAD)
    pi = mean + std * eps

    # --- Gaussian log-prob: (pi - mean)/std == eps exactly, so no divide needed.
    logp_elem = -0.5 * eps * eps - logstd - _HALF_LOG_2PI
    # tanh-squash correction with the numerically-stable softplus form.
    t = -2.0 * pi
    softplus_t = jnp.maximum(t, 0.0) + jnp.log1p(jnp.exp(-jnp.abs(t)))
    corr = 2.0 * (_LOG2 - pi - softplus_t)

    col = jax.lax.broadcasted_iota(jnp.int32, (tile_b, HEAD_PAD), 1)
    valid = col < act_dim                              # mask out padded head lanes
    logp_sum = jnp.sum(jnp.where(valid, logp_elem - corr, 0.0),
                       axis=-1, keepdims=True)         # (tile_b, 1)

    action = jnp.tanh(pi) * act_limit                  # (tile_b, HEAD_PAD)

    # --- Single lane-dense store: lanes [0, A) = action, lane A = logp, rest 0.
    out_ref[...] = jnp.where(valid, action,
                             jnp.where(col == act_dim, logp_sum, 0.0))


def stochastic_actor_forward(x, eps, packed_params, act_limit, act_dim):
    """Returns (action [B, A], logp [B]) for the SAC actor (rsample with eps)."""
    wb0, wb1, wbh = packed_params
    B, input_dim = x.shape
    assert 0 < act_dim < HEAD_PAD
    assert eps.shape == (B, HEAD_PAD)

    tile_b = B if B <= 256 else 256                    # one block at demo size
    assert B % tile_b == 0, "batch must tile evenly"
    grid = (B // tile_b,)

    kernel = functools.partial(_actor_kernel,
                               act_limit=float(act_limit), act_dim=act_dim)

    out = pl.pallas_call(
        kernel,
        grid=grid,
        out_shape=jax.ShapeDtypeStruct((B, HEAD_PAD), jnp.float32),
        in_specs=[
            pl.BlockSpec((tile_b, input_dim), lambda i: (i, 0)),    # x
            pl.BlockSpec((tile_b, HEAD_PAD), lambda i: (i, 0)),     # eps (lane-padded)
            pl.BlockSpec(wb0.shape, lambda i: (0, 0)),              # [W0; b0]
            pl.BlockSpec(wb1.shape, lambda i: (0, 0)),              # [W1; b1]
            pl.BlockSpec(wbh.shape, lambda i: (0, 0)),              # [Wm|Ws ; bm|bs] padded
        ],
        out_specs=pl.BlockSpec((tile_b, HEAD_PAD), lambda i: (i, 0)),
        compiler_params=pltpu.CompilerParams(
            dimension_semantics=("parallel",)),                     # megacore on v7x
    )(x, eps, wb0, wb1, wbh)

    # Slice the packed lane-dense output outside the kernel.
    return out[:, :act_dim], out[:, act_dim]


def _init_packed_params(key, input_dim, hid, act_dim):
    """Deterministic synthetic params, packed for the kernel:
         wb0: [input_dim+1, hid]       = [W0; b0]
         wb1: [hid+1, hid]             = [W1; b1]
         wbh: [hid+1, 2*HEAD_PAD]      = [Wm|pad | Ws|pad ; bm|pad | bs|pad]
    """
    ks = jax.random.split(key, 8)
    scale = 0.1
    w0 = scale * jax.random.normal(ks[0], (input_dim, hid), jnp.float32)
    b0 = scale * jax.random.normal(ks[1], (1, hid), jnp.float32)
    w1 = scale * jax.random.normal(ks[2], (hid, hid), jnp.float32)
    b1 = scale * jax.random.normal(ks[3], (1, hid), jnp.float32)
    wm = scale * jax.random.normal(ks[4], (hid, act_dim), jnp.float32)
    bm = scale * jax.random.normal(ks[5], (1, act_dim), jnp.float32)
    ws = scale * jax.random.normal(ks[6], (hid, act_dim), jnp.float32)
    bs = scale * jax.random.normal(ks[7], (1, act_dim), jnp.float32)

    def pad_head(w, b):
        wp = jnp.zeros((hid, HEAD_PAD), jnp.float32).at[:, :act_dim].set(w)
        bp = jnp.zeros((1, HEAD_PAD), jnp.float32).at[:, :act_dim].set(b)
        return wp, bp

    wm_p, bm_p = pad_head(wm, bm)
    ws_p, bs_p = pad_head(ws, bs)

    wb0 = jnp.concatenate([w0, b0], axis=0)
    wb1 = jnp.concatenate([w1, b1], axis=0)
    wbh = jnp.concatenate(
        [jnp.concatenate([wm_p, ws_p], axis=1),
         jnp.concatenate([bm_p, bs_p], axis=1)], axis=0)
    return wb0, wb1, wbh


def _reference_forward(x, eps, packed_params, act_limit, act_dim):
    """Pure-JAX reference mirroring torch StochasticActor.forward (rsample path)."""
    wb0, wb1, wbh = packed_params
    w0, b0 = wb0[:-1], wb0[-1]
    w1, b1 = wb1[:-1], wb1[-1]
    wm, bm = wbh[:-1, :act_dim], wbh[-1, :act_dim]
    ws, bs = wbh[:-1, HEAD_PAD:HEAD_PAD + act_dim], wbh[-1, HEAD_PAD:HEAD_PAD + act_dim]
    eps_a = eps[:, :act_dim]

    h = jnp.maximum(x @ w0 + b0, 0.0)
    h = jnp.maximum(h @ w1 + b1, 0.0)
    mean = h @ wm + bm
    logstd = jnp.clip(h @ ws + bs, LOG_STD_MIN, LOG_STD_MAX)
    std = jnp.exp(logstd)
    pi = mean + std * eps_a
    logp = jnp.sum(-0.5 * ((pi - mean) / std) ** 2 - logstd - _HALF_LOG_2PI, axis=-1)
    logp -= jnp.sum(2.0 * (_LOG2 - pi - jax.nn.softplus(-2.0 * pi)), axis=-1)
    action = jnp.tanh(pi) * act_limit
    return action, logp


if __name__ == "__main__":
    # Module-consistent small shapes: obs=24, goal=8 -> input_dim=32,
    # hid_size=32, n_hids=2, action=4, batch=8, act_limit=1.0
    B, OBS, GOAL, HID, ACT = 8, 24, 8, 32, 4
    INPUT_DIM = OBS + GOAL
    ACT_LIMIT = 1.0

    key = jax.random.PRNGKey(0)
    kx, kp, ke = jax.random.split(key, 3)
    x = jax.random.normal(kx, (B, INPUT_DIM), jnp.float32)
    params = _init_packed_params(kp, INPUT_DIM, HID, ACT)
    # rsample noise eps ~ N(0,1), lane-padded to HEAD_PAD (padded lanes are masked).
    eps = jax.random.normal(ke, (B, HEAD_PAD), jnp.float32)

    action, logp = stochastic_actor_forward(x, eps, params, ACT_LIMIT, ACT)
    jax.block_until_ready((action, logp))

    assert action.shape == (B, ACT) and logp.shape == (B,)
    assert bool(jnp.all(jnp.isfinite(action))) and bool(jnp.all(jnp.isfinite(logp)))
    assert bool(jnp.all(jnp.abs(action) <= ACT_LIMIT + 1e-6))

    # Check against a pure-JAX reference with the same eps (same rsample).
    ref_action, ref_logp = _reference_forward(x, eps, params, ACT_LIMIT, ACT)
    assert bool(jnp.allclose(action, ref_action, atol=1e-4, rtol=1e-4))
    assert bool(jnp.allclose(logp, ref_logp, atol=1e-4, rtol=1e-4))
    # TODO(synk): at these tiny shapes a plain fused XLA forward may match/beat the
    # pallas_call custom-call overhead; fuse critic heads into this kernel to amortize.
    print("KERNEL_OK")
</pallas_src>

<mosaic_0001>
module attributes {stable_mosaic.version = 11 : i64} {
  func.func @_actor_kernel(%arg0: i32, %arg1: memref<8x32xf32, #tpu.memory_space<vmem>>, %arg2: memref<8x128xf32, #tpu.memory_space<vmem>>, %arg3: memref<33x32xf32, #tpu.memory_space<vmem>>, %arg4: memref<33x32xf32, #tpu.memory_space<vmem>>, %arg5: memref<33x256xf32, #tpu.memory_space<vmem>>, %arg6: memref<8x128xf32, #tpu.memory_space<vmem>>) attributes {dimension_semantics = [#tpu.dimension_semantics<parallel>], iteration_bounds = array<i64: 1>, scalar_prefetch = 0 : i64, scratch_operands = 0 : i64, tpu.core_type = #tpu.core_type<tc>, window_params = [{transform_indices = @transform_0, window_bounds = array<i64: 8, 32>}, {transform_indices = @transform_1, window_bounds = array<i64: 8, 128>}, {pipeline_mode = #tpu.pipeline_mode<synchronous>, transform_indices = @transform_2, window_bounds = array<i64: 33, 32>}, {pipeline_mode = #tpu.pipeline_mode<synchronous>, transform_indices = @transform_3, window_bounds = array<i64: 33, 32>}, {pipeline_mode = #tpu.pipeline_mode<synchronous>, transform_indices = @transform_4, window_bounds = array<i64: 33, 256>}, {transform_indices = @transform_5, window_bounds = array<i64: 8, 128>}]} {
    %c0 = arith.constant 0 : index
    %c0_0 = arith.constant 0 : index
    %0 = vector.load %arg1[%c0, %c0_0] : memref<8x32xf32, #tpu.memory_space<vmem>>, vector<8x32xf32>
    %c0_1 = arith.constant 0 : index
    %c0_2 = arith.constant 0 : index
    %1 = vector.load %arg3[%c0_1, %c0_2] : memref<33x32xf32, #tpu.memory_space<vmem>>, vector<32x32xf32>
    %cst = arith.constant dense<0.000000e+00> : vector<8x32xf32>
    %2 = tpu.matmul %0, %1, %cst {dimension_numbers = #tpu.dot_dimension_numbers<[1], [0], [0], [1], [0, 0, 1, 1], [], []>} : vector<8x32xf32>, vector<32x32xf32>, vector<8x32xf32> -> vector<8x32xf32>
    %c32 = arith.constant 32 : index
    %c0_3 = arith.constant 0 : index
    %3 = vector.load %arg3[%c32, %c0_3] : memref<33x32xf32, #tpu.memory_space<vmem>>, vector<1x32xf32>
    %4 = vector.broadcast %3 : vector<1x32xf32> to vector<8x32xf32>
    %5 = arith.addf %2, %4 : vector<8x32xf32>
    %cst_4 = arith.constant 0.000000e+00 : f32
    %6 = vector.broadcast %cst_4 : f32 to vector<8x32xf32>
    %7 = arith.maximumf %5, %6 : vector<8x32xf32>
    %c0_5 = arith.constant 0 : index
    %c0_6 = arith.constant 0 : index
    %8 = vector.load %arg4[%c0_5, %c0_6] : memref<33x32xf32, #tpu.memory_space<vmem>>, vector<32x32xf32>
    %cst_7 = arith.constant dense<0.000000e+00> : vector<8x32xf32>
    %9 = tpu.matmul %7, %8, %cst_7 {dimension_numbers = #tpu.dot_dimension_numbers<[1], [0], [0], [1], [0, 0, 1, 1], [], []>} : vector<8x32xf32>, vector<32x32xf32>, vector<8x32xf32> -> vector<8x32xf32>
    %c32_8 = arith.constant 32 : index
    %c0_9 = arith.constant 0 : index
    %10 = vector.load %arg4[%c32_8, %c0_9] : memref<33x32xf32, #tpu.memory_space<vmem>>, vector<1x32xf32>
    %11 = vector.broadcast %10 : vector<1x32xf32> to vector<8x32xf32>
    %12 = arith.addf %9, %11 : vector<8x32xf32>
    %cst_10 = arith.constant 0.000000e+00 : f32
    %13 = vector.broadcast %cst_10 : f32 to vector<8x32xf32>
    %14 = arith.maximumf %12, %13 : vector<8x32xf32>
    %c0_11 = arith.constant 0 : index
    %c0_12 = arith.constant 0 : index
    %15 = vector.load %arg5[%c0_11, %c0_12] : memref<33x256xf32, #tpu.memory_space<vmem>>, vector<32x256xf32>
    %cst_13 = arith.constant dense<0.000000e+00> : vector<8x256xf32>
    %16 = tpu.matmul %14, %15, %cst_13 {dimension_numbers = #tpu.dot_dimension_numbers<[1], [0], [0], [1], [0, 0, 1, 1], [], []>} : vector<8x32xf32>, vector<32x256xf32>, vector<8x256xf32> -> vector<8x256xf32>
    %c32_14 = arith.constant 32 : index
    %c0_15 = arith.constant 0 : index
    %17 = vector.load %arg5[%c32_14, %c0_15] : memref<33x256xf32, #tpu.memory_space<vmem>>, vector<1x256xf32>
    %18 = vector.broadcast %17 : vector<1x256xf32> to vector<8x256xf32>
    %19 = arith.addf %16, %18 : vector<8x256xf32>
    %20 = vector.extract_strided_slice %19 {offsets = [0, 0], sizes = [8, 128], strides = [1, 1]} : vector<8x256xf32> to vector<8x128xf32>
    %21 = vector.extract_strided_slice %19 {offsets = [0, 128], sizes = [8, 128], strides = [1, 1]} : vector<8x256xf32> to vector<8x128xf32>
    %cst_16 = arith.constant -2.000000e+01 : f32
    %cst_17 = arith.constant 2.000000e+00 : f32
    %22 = vector.broadcast %cst_16 : f32 to vector<8x128xf32>
    %23 = arith.maximumf %22, %21 : vector<8x128xf32>
    %24 = vector.broadcast %cst_17 : f32 to vector<8x128xf32>
    %25 = arith.minimumf %24, %23 : vector<8x128xf32>
    %26 = math.exp %25 : vector<8x128xf32>
    %c0_18 = arith.constant 0 : index
    %c0_19 = arith.constant 0 : index
    %27 = vector.load %arg2[%c0_18, %c0_19] : memref<8x128xf32, #tpu.memory_space<vmem>>, vector<8x128xf32>
    %28 = arith.mulf %26, %27 : vector<8x128xf32>
    %29 = arith.addf %20, %28 : vector<8x128xf32>
    %cst_20 = arith.constant -5.000000e-01 : f32
    %30 = vector.broadcast %cst_20 : f32 to vector<8x128xf32>
    %31 = arith.mulf %30, %27 : vector<8x128xf32>
    %32 = arith.mulf %31, %27 : vector<8x128xf32>
    %33 = arith.subf %32, %25 : vector<8x128xf32>
    %cst_21 = arith.constant 0.918938517 : f32
    %34 = vector.broadcast %cst_21 : f32 to vector<8x128xf32>
    %35 = arith.subf %33, %34 : vector<8x128xf32>
    %cst_22 = arith.constant -2.000000e+00 : f32
    %36 = vector.broadcast %cst_22 : f32 to vector<8x128xf32>
    %37 = arith.mulf %36, %29 : vector<8x128xf32>
    %cst_23 = arith.constant 0.000000e+00 : f32
    %38 = vector.broadcast %cst_23 : f32 to vector<8x128xf32>
    %39 = arith.maximumf %37, %38 : vector<8x128xf32>
    %40 = math.absf %37 : vector<8x128xf32>
    %cst_24 = arith.constant 0.000000e+00 : f32
    %41 = vector.broadcast %cst_24 : f32 to vector<8x128xf32>
    %42 = arith.subf %41, %40 : vector<8x128xf32>
    %43 = math.exp %42 : vector<8x128xf32>
    %44 = math.log1p %43 : vector<8x128xf32>
    %45 = arith.addf %39, %44 : vector<8x128xf32>
    %cst_25 = arith.constant 0.693147182 : f32
    %46 = vector.broadcast %cst_25 : f32 to vector<8x128xf32>
    %47 = arith.subf %46, %29 : vector<8x128xf32>
    %48 = arith.subf %47, %45 : vector<8x128xf32>
    %cst_26 = arith.constant 2.000000e+00 : f32
    %49 = vector.broadcast %cst_26 : f32 to vector<8x128xf32>
    %50 = arith.mulf %49, %48 : vector<8x128xf32>
    %51 = tpu.iota {dimensions = array<i32: 1>} : vector<8x128xi32>
    %c4_i32 = arith.constant 4 : i32
    %52 = vector.broadcast %c4_i32 : i32 to vector<8x128xi32>
    %53 = arith.cmpi slt, %51, %52 : vector<8x128xi32>
    %54 = arith.subf %35, %50 : vector<8x128xf32>
    %cst_27 = arith.constant 0.000000e+00 : f32
    %55 = vector.broadcast %cst_27 : f32 to vector<8x128xf32>
    %56 = arith.select %53, %54, %55 : vector<8x128xi1>, vector<8x128xf32>
    %cst_28 = arith.constant dense<0.000000e+00> : vector<8xf32>
    %57 = vector.multi_reduction <add>, %56, %cst_28 [1] : vector<8x128xf32> to vector<8xf32>
    %58 = vector.shape_cast %57 : vector<8xf32> to vector<8x1xf32>
    %59 = math.tanh %29 : vector<8x128xf32>
    %cst_29 = arith.constant 1.000000e+00 : f32
    %60 = vector.broadcast %cst_29 : f32 to vector<8x128xf32>
    %61 = arith.mulf %59, %60 : vector<8x128xf32>
    %c4_i32_30 = arith.constant 4 : i32
    %62 = vector.broadcast %c4_i32_30 : i32 to vector<8x128xi32>
    %63 = arith.cmpi eq, %51, %62 : vector<8x128xi32>
    %cst_31 = arith.constant 0.000000e+00 : f32
    %64 = vector.shape_cast %58 : vector<8x1xf32> to vector<8x1xf32>
    %65 = vector.broadcast %64 : vector<8x1xf32> to vector<8x128xf32>
    %66 = vector.broadcast %cst_31 : f32 to vector<8x128xf32>
    %67 = arith.select %63, %65, %66 : vector<8x128xi1>, vector<8x128xf32>
    %68 = arith.select %53, %61, %67 : vector<8x128xi1>, vector<8x128xf32>
    %c0_32 = arith.constant 0 : index
    %c0_33 = arith.constant 0 : index
    %69 = vector.load %arg6[%c0_32, %c0_33] : memref<8x128xf32, #tpu.memory_space<vmem>>, vector<8x128xf32>
    tpu.vector_store %arg6[%c0_32, %c0_33], %68 {strides = array<i32>} : memref<8x128xf32, #tpu.memory_space<vmem>>, vector<8x128xf32>,
    return
  }
  func.func @transform_0(%arg0: i32) -> (i32, i32) {
    %c0_i32 = arith.constant 0 : i32
    %c0_i32_0 = arith.constant 0 : i32
    return %arg0, %c0_i32 : i32, i32
  }
  func.func @transform_1(%arg0: i32) -> (i32, i32) {
    %c0_i32 = arith.constant 0 : i32
    %c0_i32_0 = arith.constant 0 : i32
    return %arg0, %c0_i32 : i32, i32
  }
  func.func @transform_2(%arg0: i32) -> (i32, i32) {
    %c0_i32 = arith.constant 0 : i32
    %c0_i32_0 = arith.constant 0 : i32
    %c0_i32_1 = arith.constant 0 : i32
    return %c0_i32, %c0_i32_0 : i32, i32
  }
  func.func @transform_3(%arg0: i32) -> (i32, i32) {
    %c0_i32 = arith.constant 0 : i32
    %c0_i32_0 = arith.constant 0 : i32
    %c0_i32_1 = arith.constant 0 : i32
    return %c0_i32, %c0_i32_0 : i32, i32
  }
  func.func @transform_4(%arg0: i32) -> (i32, i32) {
    %c0_i32 = arith.constant 0 : i32
    %c0_i32_0 = arith.constant 0 : i32
    %c0_i32_1 = arith.constant 0 : i32
    return %c0_i32, %c0_i32_0 : i32, i32
  }
  func.func @transform_5(%arg0: i32) -> (i32, i32) {
    %c0_i32 = arith.constant 0 : i32
    %c0_i32_0 = arith.constant 0 : i32
    return %arg0, %c0_i32 : i32, i32
  }
}

</mosaic_0001>

<bundles_post_ra>
// kernel: tpu_custom_call.1
= control target key start
LH: loop header
LB: loop body
LE: loop exit
PB: predicated region body
PF: predicated region fallthrough
CT: control target
= control target key end

     0   :  { %v412_v1 = vmov 0.0   ;;  %vm413_vm0 = vmmov 0   ;;  %s514_s0 = inlined_call_operand.vmem [shape: f32[8,32], index: 0, kind: input, shape index: {}]   ;;  %s515_s1 = inlined_call_operand.vmem [shape: f32[8,128], index: 1, kind: input, shape index: {}]   ;;  %s516_s2 = inlined_call_operand.vmem [shape: f32[33,32], index: 2, kind: input, shape index: {}]   ;;  %s517_s3 = inlined_call_operand.vmem [shape: f32[33,32], index: 3, kind: input, shape index: {}]   ;;  %s518_s4 = inlined_call_operand.vmem [shape: f32[33,256], index: 4, kind: input, shape index: {}]   ;;  %s519_s5 = inlined_call_operand.hbm [shape: f32[8,128], index: 5, kind: output, shape index: {}]  }
   0x1   :  { %v25_v0 = vld [vmem:[%s516_s2 + $0x18] sm:$0xff]  ;;  %357 = vmatprep.subr.mxu0 %v412_v1  ;;  %v24_v2 = vld [vmem:[%s516_s2 + $0x10] sm:$0xff]  ;;  %365 = vmatprep.mubr.msk.f32.mxu0 %vm413_vm0, %v412_v1 }
   0x2   :  { %v109_v3 = vld [vmem:[%s517_s3 + $0x18] sm:$0xff]  ;;  %358 = vmatpush3.msra.mxu0 %v25_v0  ;;  %368 = vmatprep.subr.mxu1 %v412_v1 }
   0x3   :  { %10 = vsyncpa [#allocation3], 0  ;;  %359 = vmatprep.subr.mxu0 %v412_v1  ;;  %v23_v4 = vld [vmem:[%s516_s2 + $0x8] sm:$0xff]  ;;  %369 = vmatpush3.msra.mxu1 %v109_v3  ;;  %v22_v5 = vld [vmem:[%s516_s2] sm:$0xff]  ;;  %vm31_vm1 = vcmask 261120   ;;  %v200_v28 = vlaneseq }
   0x4   :  { %360 = vmatpush3.msra.mxu0 %v24_v2  ;;  %370 = vmatprep.subr.mxu1 %v412_v1  ;;  %v21_v6 = vld [vmem:[%s514_s0] sm:$0xff]  ;;  %v108_v7 = vld [vmem:[%s517_s3 + $0x10] sm:$0xff]  ;;  %v107_v8 = vld [vmem:[%s517_s3 + $0x8] sm:$0xff] }
   0x5   :  { %361 = vmatprep.subr.mxu0 %v412_v1  ;;  %376 = vmatprep.mubr.msk.f32.mxu1 %vm413_vm0, %v412_v1  ;;  %v106_v9 = vld [vmem:[%s517_s3] sm:$0xff]  ;;  %v196_v10 = vld [vmem:[%s518_s4 + $0x38] sm:$0xff]  ;;  %v195_v11 = vld [vmem:[%s518_s4 + $0x30] sm:$0xff]  ;;  %v201_v29 = vshrl.u32 %v200_v28, 7 }
   0x6   :  { %362 = vmatpush3.msra.mxu0 %v23_v4  ;;  %371 = vmatpush3.msra.mxu1 %v108_v7  ;;  %v194_v12 = vld [vmem:[%s518_s4 + $0x28] sm:$0xff]  ;;  %v340_v13 = vld [vmem:[%s516_s2 + $0x20] ss:$0 sm:$0xff]  ;;  %v192_v19 = vld [vmem:[%s518_s4 + $0x18] sm:$0xff] }
   0x7   :  { %363 = vmatprep.subr.mxu0 %v412_v1  ;;  %372 = vmatprep.subr.mxu1 %v412_v1  ;;  %v193_v18 = vld [vmem:[%s518_s4 + $0x20] sm:$0xff]  ;;  %v191_v20 = vld [vmem:[%s518_s4 + $0x10] sm:$0xff]  ;;  %v190_v21 = vld [vmem:[%s518_s4 + $0x8] sm:$0xff]  ;;  %v206_v30 = vsub.s32 1, %v201_v29  ;;  %v202_v39 = vsub.s32 0, %v201_v29 }
   0x8   :  { %364 = vmatpush3.msra.mxu0 %v22_v5  ;;  %373 = vmatpush3.msra.mxu1 %v107_v8  ;;  %v189_v22 = vld [vmem:[%s518_s4] sm:$0xff] }
   0x9   :  { %366 = vmatmul.mubr.msk.f32.vlgmr.msra.gmra.mxu0 %vm31_vm1, %v21_v6  ;;  %374 = vmatprep.subr.mxu1 %v412_v1  ;;  %v342_v23 = vld [vmem:[%s517_s3 + $0x20] ss:$0 sm:$0xff] }
   0xa   :  { %277 = vmatprep.mubr.f32.mxu0 %v412_v1  ;;  %375 = vmatpush3.msra.mxu1 %v106_v9  ;;  %v344_v31 = vld [vmem:[%s518_s4 + $0x40] ss:$8 sm:$0x3]  ;;  %v315_v1 = vand.u32 127, %v200_v28 }
   0xb   :  { %237 = vmatprep.subr.mxu0 %v196_v10  ;;  %v207_v32 = vrot.slane %v344_v31, %v206_v30  ;;  %v203_v40 = vrot.slane %v344_v31, %v202_v39  ;;  %v288_v42 = vld [vmem:[%s515_s1] sm:$0xff]  ;;  %s414_s1 = smov [#allocation2]  }
   0xc   :  { %238 = vmatpush1.msra.mxu0 %v195_v11  ;;  %v291_v53 = vmul.f32 -0.5, %v288_v42  ;;  %vm316_vm3 = vcmp.lt.s32.totalorder %v315_v1, 4  ;;  %vm322_vm4 = vcmp.eq.s32.totalorder %v315_v1, 4  ;;  %s332_s4 = sshll.u32 %s414_s1, 4  ;;  %s333_s4 = int_to_ptr.vmem [resolvable:$true] %s332_s4 }
   0xd   :  { %239 = vmatprep.subr.mxu0 %v194_v12  ;;  %s390_s7 = scalar_lea.vmem %s333_s4, 128  ;;  %p395_p1 = scmp.lt.s32.totalorder %s333_s4, %s333_s4 }
   0xe   :  { %240 = vmatpush1.msra.mxu0 %v193_v18  ;;  %v292_v57 = vmul.f32 %v291_v53, %v288_v42  ;;  %p391_p0 = scmp.ne.s32.totalorder %s333_s4, %s390_s7  ;;  %p396_p2 = scmp.lt.s32.totalorder %s390_s7, %s390_s7 }
   0xf   :  { %241 = vmatprep.subr.mxu0 %v192_v19 }
  0x10   :  { %242 = vmatpush1.msra.mxu0 %v191_v20  ;;  %p397_p3 = por %p396_p2, %p395_p1 }
  0x11   :  { %243 = vmatprep.subr.mxu0 %v190_v21 }
  0x12   :  { %244 = vmatpush1.msra.mxu0 %v189_v22  ;;  %p398_p4 = pnand %p397_p3, %p391_p0 }
  0xc9   :  { %v101_v14 = vpop.f32.mrf.mxu0 }
  0xca   :  { %v102_v15 = vadd.f32 %v340_v13, %v101_v14 }
  0xcb   :  { %v367_v16 = vpop.f32.mrf.mxu0 }
  0xcc   :  { %v105_v17 = vmax.f32 %v102_v15, 0.0 }
  0xce   :  { %377 = vmatmul.mubr.msk.f32.vlgmr.msra.gmra.mxu1 %vm31_vm1, %v105_v17 }
 0x18e   :  { %v184_v24 = vpop.f32.mrf.mxu1 }
 0x18f   :  { %v185_v25 = vadd.f32 %v342_v23, %v184_v24 }
 0x190   :  { %v378_v26 = vpop.f32.mrf.mxu1 }
 0x191   :  { %v188_v27 = vmax.f32 %v185_v25, 0.0 }
 0x193   :  { %345 = vmatmul.mubr.msk.f32.vlgmr.msra.gmra.mxu0 %vm31_vm1, %v188_v27 }
 0x253   :  { %v279_v33 = vpop.f32.mrf.mxu0 }
 0x254   :  { %v280_v43 = vadd.f32 %v279_v33, %v203_v40 }
 0x255   :  { %v281_v34 = vpop.f32.mrf.mxu0 }
 0x256   :  { %v282_v35 = vadd.f32 %v281_v34, %v207_v32 }
 0x258   :  { %v284_v36 = vmax.f32 %v282_v35, -20.0 }
 0x25a   :  { %v285_v37 = vmin.f32 %v284_v36, 2.0 }
 0x25c   :  { %v286_v38 = vmul.f32 1.442695, %v285_v37  ;;  %v293_v62 = vsub.f32 %v292_v57, %v285_v37 }
 0x25e   :  { %382 = vpow2.f32 %v286_v38  ;;  %v346_v3 = vadd.f32 -0.9189385, %v293_v62 }
 0x26b   :  { %v383_v41 = vpop.eup %382 }
 0x26c   :  { %v289_v44 = vmul.f32 %v383_v41, %v288_v42 }
 0x26e   :  { %v290_v45 = vadd.f32 %v289_v44, %v280_v43 }
 0x270   :  { %v295_v46 = vmul.f32 -2.0, %v290_v45  ;;  %v311_v0 = vsub.f32 0.6931472, %v290_v45 }
 0x272   :  { %v297_v47 = vand.u32 2147483647, %v295_v46  ;;  %v296_v60 = vmax.f32 %v295_v46, 0.0 }
 0x274   :  { %v298_v48 = vsub.f32 0.0, %v297_v47 }
 0x276   :  { %v299_v49 = vmul.f32 1.442695, %v298_v48 }
 0x278   :  { %384 = vpow2.f32 %v299_v49 }
 0x285   :  { %v385_v50 = vpop.eup %384 }
 0x286   :  { %v301_v51 = vadd.f32 1.0, %v385_v50  ;;  %v304_v52 = vmul.f32 -0.5, %v385_v50  ;;  %v307_v55 = vand.u32 2147483647, %v385_v50 }
 0x288   :  { %386 = vlog2.f32 %v301_v51  ;;  %v305_v54 = vadd.f32 1.0, %v304_v52  ;;  %vm308_vm2 = vcmp.lt.f32.partialorder %v307_v55, 0.0004427343 }
 0x289   :  { %388 = vtanh.f32 %v290_v45 }
 0x28a   :  { %v306_v59 = vmul.f32 %v385_v50, %v305_v54 }
 0x295   :  { %v387_v56 = vpop.eup %386 }
 0x296   :  { %v303_v58 = vmul.f32 0.6931472, %v387_v56  ;;  %v389_v8 = vpop.eup %388 }
 0x298   :  { %v309_v61 = vsel %vm308_vm2, %v306_v59, %v303_v58 }
 0x299   :  { %v310_v63 = vadd.f32 %v309_v61, %v296_v60 }
 0x29b   :  { %v312_v2 = vsub.f32 %v311_v0, %v310_v63 }
 0x29d   :  { %v313_v4 = vmul.f32 2.0, %v312_v2 }
 0x29f   :  { %v317_v5 = vsub.f32 %v346_v3, %v313_v4 }
 0x2a1   :  { %v318_v6 = vsel %vm316_vm3, %v317_v5, 0.0 }
 0x2a2   :  { %319 = vadd.xlane.f32.xlu0 %v318_v6 }
 0x32b   :  { %v320_v7 = vpop.xlane.xlu0 %319 }
 0x32c   :  { %v323_v9 = vsel %vm322_vm4, %v320_v7, 0.0 }
 0x32d   :  { %v324_v10 = vsel %vm316_vm3, %v389_v8, %v323_v9 }
 0x32e   :  { %325 = vst [vmem:[#allocation2] sm:$0xff] %v324_v10 }
 0x32f   :  { %401 = shalt.err (!%p398_p4)
}
 0x330   :  { %335 = dma.vmem_to_hbm [thread:$0]  %s333_s4, 128, %s519_s5, [#allocation3]  }
 0x331   :  { %410 = dma.done.wait [#allocation3], 128  }
 0x332   :  { %411 = vsyncadd [#allocation3], 4294967168 }
 0x333   :  { %339 = vsyncpa [#allocation3], 1 }

</bundles_post_ra>
